<compile_context>
chip_gen: v7x
topology: tpu7x:2x2x1
jax: 0.10.0
libtpu: 0.0.40
codegen_flags: <defaults>
</compile_context>

<pallas_src>
import functools

import jax
import jax.numpy as jnp
import numpy as np
from jax import lax
from jax.experimental import pallas as pl
from jax.experimental.pallas import tpu as pltpu


def _round_up(v, m):
    return ((v + m - 1) // m) * m


@functools.lru_cache(maxsize=None)
def _make_readout_kernel(pool_type: str, num_graphs_pad: int):
    """Build a kernel specialized on pooling type and padded graph count."""

    def _mask(b, tn, dtype):
        # one-hot graph membership [TN, G_pad]; padded rows (id == G_pad)
        # match nothing and therefore contribute nothing.
        g_iota = lax.broadcasted_iota(jnp.int32, (tn, num_graphs_pad), 1)
        return (b == g_iota).astype(dtype)

    if pool_type == "mean":

        def kernel(x_ref, b_ref, sum_ref, cnt_out_ref, acc_ref, cnt_ref):
            t = pl.program_id(1)

            @pl.when(t == 0)
            def _init():
                acc_ref[...] = jnp.zeros(acc_ref.shape, acc_ref.dtype)
                cnt_ref[...] = jnp.zeros(cnt_ref.shape, cnt_ref.dtype)

            x = x_ref[...]                    # native dtype (bf16 ok on MXU)
            b = b_ref[...]                    # [TN, 1] int32
            tn = x.shape[0]
            m = _mask(b, tn, x.dtype)         # [TN, G_pad]
            acc_ref[...] += lax.dot_general(
                m, x, dimension_numbers=(((0,), (0,)), ((), ())),
                preferred_element_type=jnp.float32)
            # per-graph node counts, also via the MXU (no XLU reduce /
            # lane broadcast); every lane of cnt holds the same count.
            cnt_ref[...] += lax.dot_general(
                m, jnp.ones((tn, 128), x.dtype),
                dimension_numbers=(((0,), (0,)), ((), ())),
                preferred_element_type=jnp.float32)

            @pl.when(t == pl.num_programs(1) - 1)
            def _fin():
                sum_ref[...] = acc_ref[...]
                cnt_out_ref[...] = cnt_ref[...]

        return kernel

    if pool_type == "max":

        def kernel(x_ref, b_ref, out_ref, acc_ref):
            t = pl.program_id(1)

            @pl.when(t == 0)
            def _init():
                acc_ref[...] = jnp.full(acc_ref.shape, -jnp.inf, acc_ref.dtype)

            x = x_ref[...].astype(jnp.float32)   # compares/max in f32 (v5e-safe)
            b = b_ref[...]                       # [TN, 1]

            def one_graph(g):
                mg = b == g                                           # [TN, 1]
                col = jnp.max(jnp.where(mg, x, -jnp.inf),
                              axis=0, keepdims=True)                  # [1, D]
                acc_ref[pl.ds(g, 1), :] = jnp.maximum(
                    acc_ref[pl.ds(g, 1), :], col)

            if num_graphs_pad <= 64:
                for g in range(num_graphs_pad):   # small static unroll, in-place rows
                    one_graph(g)
            else:
                # TODO(synk): for large / sorted graph batches, use scalar-prefetched
                # per-tile graph ranges instead of looping over all graphs.
                def body(g, carry):
                    one_graph(g)
                    return carry
                lax.fori_loop(0, num_graphs_pad, body, 0)

            @pl.when(t == pl.num_programs(1) - 1)
            def _fin():
                out_ref[...] = acc_ref[...]

        return kernel

    # pool_type == "add"
    def kernel(x_ref, b_ref, out_ref, acc_ref):
        t = pl.program_id(1)

        @pl.when(t == 0)
        def _init():
            acc_ref[...] = jnp.zeros(acc_ref.shape, acc_ref.dtype)

        x = x_ref[...]
        b = b_ref[...]
        tn = x.shape[0]
        m = _mask(b, tn, x.dtype)
        acc_ref[...] += lax.dot_general(
            m, x, dimension_numbers=(((0,), (0,)), ((), ())),
            preferred_element_type=jnp.float32)

        @pl.when(t == pl.num_programs(1) - 1)
        def _fin():
            out_ref[...] = acc_ref[...]

    return kernel


@functools.partial(
    jax.jit, static_argnames=("num_graphs", "pool_type", "tile_n", "num_splits"))
def graph_readout_pallas(x, batch, *, num_graphs, pool_type, tile_n=1024,
                         num_splits=1):
    """x: [N, D] float, batch: [N] int graph ids -> [num_graphs, D]."""
    n, d = x.shape
    g_pad = _round_up(max(int(num_graphs), 1), 8)   # full-sublane accumulator rows
    itemsize = jnp.dtype(x.dtype).itemsize
    splits = max(1, int(num_splits))

    # Big node tiles (HBM-bound streaming), clamped by an explicit VMEM budget
    # so the same defaults also fit v7x's 64 MiB physical VMEM.
    tile = min(int(tile_n), _round_up(n, 8))
    tile = max(8, _round_up(tile, 8))

    def _vmem_bytes(t):
        return (2 * t * d * itemsize            # x, double buffered
                + 2 * t * 128 * 4               # batch tile (lane padded), x2
                + g_pad * d * 4                 # accumulator
                + g_pad * 128 * 4               # counts scratch
                + 2 * g_pad * (d + 128) * 4)    # output blocks

    vmem_budget = 40 * 1024 * 1024
    while tile > 8 and _vmem_bytes(tile) > vmem_budget:
        tile = max(8, _round_up(tile // 2, 8))

    n_pad = _round_up(max(n, 1), tile * splits)
    tiles_per_split = n_pad // (tile * splits)

    if n_pad != n:
        # Pad with an out-of-range graph id: padded rows match no graph.
        x = jnp.pad(x, ((0, n_pad - n), (0, 0)))
        batch = jnp.pad(batch, (0, n_pad - n), constant_values=g_pad)
    batch2d = batch.reshape(n_pad, 1).astype(jnp.int32)

    kernel = _make_readout_kernel(pool_type, g_pad)

    node_map = lambda s, t: (s * tiles_per_split + t, 0)
    x_spec = pl.BlockSpec((tile, d), node_map)
    b_spec = pl.BlockSpec((tile, 1), node_map)
    part_spec = pl.BlockSpec((None, g_pad, d), lambda s, t: (s, 0, 0))

    if pool_type == "mean":
        out_shape = (jax.ShapeDtypeStruct((splits, g_pad, d), jnp.float32),
                     jax.ShapeDtypeStruct((splits, g_pad, 128), jnp.float32))
        out_specs = (part_spec,
                     pl.BlockSpec((None, g_pad, 128), lambda s, t: (s, 0, 0)))
        scratch = [pltpu.VMEM((g_pad, d), jnp.float32),
                   pltpu.VMEM((g_pad, 128), jnp.float32)]
    else:
        out_shape = jax.ShapeDtypeStruct((splits, g_pad, d), jnp.float32)
        out_specs = part_spec
        scratch = [pltpu.VMEM((g_pad, d), jnp.float32)]

    vmem_limit = int(min(max(2 * _vmem_bytes(tile), 16 * 1024 * 1024),
                         48 * 1024 * 1024))

    res = pl.pallas_call(
        kernel,
        out_shape=out_shape,
        grid_spec=pltpu.PrefetchScalarGridSpec(
            num_scalar_prefetch=0,
            grid=(splits, tiles_per_split),
            in_specs=[x_spec, b_spec],
            out_specs=out_specs,
            scratch_shapes=scratch),
        compiler_params=pltpu.CompilerParams(
            dimension_semantics=("parallel", "arbitrary"),
            vmem_limit_bytes=vmem_limit),
    )(x, batch2d)

    # Combine per-split partials (tiny; also where 'mean' division happens).
    if pool_type == "mean":
        sums, cnts = res
        total = jnp.sum(sums, axis=0)[:num_graphs]
        cnt = jnp.sum(cnts, axis=0)[:num_graphs, :1]
        out = total / jnp.maximum(cnt, 1.0)
    elif pool_type == "max":
        out = jnp.max(res, axis=0)[:num_graphs]
    else:
        out = jnp.sum(res, axis=0)[:num_graphs]
    return out.astype(x.dtype)


def _default_num_splits():
    # v7x has 2 TensorCores per chip; split the node axis across them via a
    # leading 'parallel' grid axis. v5e/v6e have a single TC -> 1 split.
    try:
        kind = jax.devices()[0].device_kind.lower()
    except Exception:
        return 1
    return 2 if "v7" in kind else 1


class GRAPH_READOUT:
    """JAX/Pallas mirror of the PyTorch GRAPH_READOUT module (no parameters)."""

    def __init__(self, type, num_graphs=None, tile_n=1024, num_splits=None):
        assert type in ("max", "mean", "add")
        self.type = type
        self.num_graphs = num_graphs     # pass to avoid a host sync per call
        self.tile_n = tile_n
        self.num_splits = (_default_num_splits()
                           if num_splits is None else num_splits)

    def forward(self, x, batch, num_graphs=None):
        ng = num_graphs if num_graphs is not None else self.num_graphs
        if ng is None:
            # Output shape depends on data; this host sync is avoided entirely
            # when the caller supplies num_graphs.
            ng = int(jax.device_get(jnp.max(batch))) + 1
        return graph_readout_pallas(x, batch, num_graphs=int(ng),
                                    pool_type=self.type, tile_n=self.tile_n,
                                    num_splits=self.num_splits)

    __call__ = forward


def _reference(x, batch, num_graphs, pool_type):
    x = np.asarray(x, dtype=np.float32)
    batch = np.asarray(batch)
    d = x.shape[1]
    out = np.zeros((num_graphs, d), dtype=np.float32)
    if pool_type == "max":
        out[:] = -np.inf
        for i in range(x.shape[0]):
            out[batch[i]] = np.maximum(out[batch[i]], x[i])
    else:
        cnt = np.zeros((num_graphs, 1), dtype=np.float32)
        for i in range(x.shape[0]):
            out[batch[i]] += x[i]
            cnt[batch[i]] += 1.0
        if pool_type == "mean":
            out = out / np.maximum(cnt, 1.0)
    return out


if __name__ == "__main__":
    key = jax.random.PRNGKey(0)
    kx, kb, kx2 = jax.random.split(key, 3)

    # Case 1: sorted PyG-style batch, node count a multiple of 8.
    num_nodes, num_feat, num_graphs = 64, 128, 8
    x1 = jax.random.normal(kx, (num_nodes, num_feat), dtype=jnp.float32)
    batch1 = jnp.repeat(jnp.arange(num_graphs, dtype=jnp.int32),
                        num_nodes // num_graphs)

    # Case 2: ragged node count, unsorted graph ids, explicit num_graphs.
    n2, g2 = 50, 5
    x2 = jax.random.normal(kx2, (n2, num_feat), dtype=jnp.float32)
    batch2 = jax.random.randint(kb, (n2,), 0, g2, dtype=jnp.int32)

    for pool_type in ("add", "mean", "max"):
        mod = GRAPH_READOUT(pool_type)                 # num_graphs derived
        out1 = jax.block_until_ready(mod(x1, batch1))
        np.testing.assert_allclose(
            np.asarray(out1),
            _reference(x1, batch1, num_graphs, pool_type),
            rtol=1e-5, atol=1e-5)

        mod2 = GRAPH_READOUT(pool_type, num_graphs=g2)  # no host sync
        out2 = jax.block_until_ready(mod2(x2, batch2))
        np.testing.assert_allclose(
            np.asarray(out2),
            _reference(x2, batch2, g2, pool_type),
            rtol=1e-5, atol=1e-5)

        # bf16 path: streams bf16 straight into the MXU with f32 accumulation.
        x1b = x1.astype(jnp.bfloat16)
        out_b = jax.block_until_ready(mod(x1b, batch1)).astype(jnp.float32)
        np.testing.assert_allclose(
            np.asarray(out_b),
            _reference(x1b.astype(jnp.float32), batch1, num_graphs, pool_type),
            rtol=2e-2, atol=2e-2)

    print("KERNEL_OK")
</pallas_src>

<mosaic_0001>
module attributes {stable_mosaic.version = 11 : i64} {
  func.func @kernel(%arg0: i32, %arg1: i32, %arg2: memref<64x128xf32, #tpu.memory_space<vmem>>, %arg3: memref<64x1xi32, #tpu.memory_space<vmem>>, %arg4: memref<1x8x128xf32, #tpu.memory_space<vmem>>, %arg5: memref<8x128xf32, #tpu.memory_space<vmem>>) attributes {dimension_semantics = [#tpu.dimension_semantics<parallel>, #tpu.dimension_semantics<arbitrary>], iteration_bounds = array<i64: 1, 1>, scalar_prefetch = 0 : i64, scratch_operands = 1 : i64, tpu.core_type = #tpu.core_type<tc>, window_params = [{transform_indices = @transform_0, window_bounds = array<i64: 64, 128>}, {transform_indices = @transform_1, window_bounds = array<i64: 64, 1>}, {transform_indices = @transform_2, window_bounds = array<i64: 1, 8, 128>}]} {
    %c0_i32 = arith.constant 0 : i32
    %0 = arith.cmpi eq, %arg1, %c0_i32 : i32
    %1 = arith.extui %0 : i1 to i32
    %c0_i32_0 = arith.constant 0 : i32
    %2 = arith.cmpi ne, %1, %c0_i32_0 : i32
    scf.if %2 {
      %cst_10 = arith.constant 0.000000e+00 : f32
      %17 = vector.broadcast %cst_10 : f32 to vector<8x128xf32>
      %c0_11 = arith.constant 0 : index
      %c0_12 = arith.constant 0 : index
      %18 = vector.load %arg5[%c0_11, %c0_12] : memref<8x128xf32, #tpu.memory_space<vmem>>, vector<8x128xf32>
      tpu.vector_store %arg5[%c0_11, %c0_12], %17 {strides = array<i32>} : memref<8x128xf32, #tpu.memory_space<vmem>>, vector<8x128xf32>,
    } else {
    }
    %c0 = arith.constant 0 : index
    %c0_1 = arith.constant 0 : index
    %3 = vector.load %arg2[%c0, %c0_1] : memref<64x128xf32, #tpu.memory_space<vmem>>, vector<64x128xf32>
    %c0_2 = arith.constant 0 : index
    %c0_3 = arith.constant 0 : index
    %4 = vector.load %arg3[%c0_2, %c0_3] : memref<64x1xi32, #tpu.memory_space<vmem>>, vector<64x1xi32>
    %5 = tpu.iota {dimensions = array<i32: 1>} : vector<64x8xi32>
    %6 = vector.broadcast %4 : vector<64x1xi32> to vector<64x8xi32>
    %7 = arith.cmpi eq, %6, %5 : vector<64x8xi32>
    %8 = arith.extui %7 : vector<64x8xi1> to vector<64x8xi32>
    %9 = arith.sitofp %8 : vector<64x8xi32> to vector<64x8xf32>
    %c0_4 = arith.constant 0 : index
    %c0_5 = arith.constant 0 : index
    %10 = vector.load %arg5[%c0_4, %c0_5] : memref<8x128xf32, #tpu.memory_space<vmem>>, vector<8x128xf32>
    %cst = arith.constant dense<0.000000e+00> : vector<8x128xf32>
    %11 = tpu.matmul %9, %3, %cst {dimension_numbers = #tpu.dot_dimension_numbers<[0], [0], [1], [1], [0, 1, 1, 1], [], []>} : vector<64x8xf32>, vector<64x128xf32>, vector<8x128xf32> -> vector<8x128xf32>
    %12 = arith.addf %10, %11 : vector<8x128xf32>
    %c0_6 = arith.constant 0 : index
    %c0_7 = arith.constant 0 : index
    %13 = vector.load %arg5[%c0_6, %c0_7] : memref<8x128xf32, #tpu.memory_space<vmem>>, vector<8x128xf32>
    tpu.vector_store %arg5[%c0_6, %c0_7], %12 {strides = array<i32>} : memref<8x128xf32, #tpu.memory_space<vmem>>, vector<8x128xf32>,
    %c0_i32_8 = arith.constant 0 : i32
    %14 = arith.cmpi eq, %arg1, %c0_i32_8 : i32
    %15 = arith.extui %14 : i1 to i32
    %c0_i32_9 = arith.constant 0 : i32
    %16 = arith.cmpi ne, %15, %c0_i32_9 : i32
    scf.if %16 {
      %c0_10 = arith.constant 0 : index
      %c0_11 = arith.constant 0 : index
      %17 = vector.load %arg5[%c0_10, %c0_11] : memref<8x128xf32, #tpu.memory_space<vmem>>, vector<8x128xf32>
      %c0_12 = arith.constant 0 : index
      %c0_13 = arith.constant 0 : index
      %c0_14 = arith.constant 0 : index
      %18 = vector.load %arg4[%c0_12, %c0_13, %c0_14] : memref<1x8x128xf32, #tpu.memory_space<vmem>>, vector<1x8x128xf32>
      %19 = vector.shape_cast %18 : vector<1x8x128xf32> to vector<8x128xf32>
      %20 = vector.shape_cast %17 : vector<8x128xf32> to vector<1x8x128xf32>
      tpu.vector_store %arg4[%c0_12, %c0_13, %c0_14], %20 {strides = array<i32>} : memref<1x8x128xf32, #tpu.memory_space<vmem>>, vector<1x8x128xf32>,
    } else {
    }
    return
  }
  func.func @transform_0(%arg0: i32, %arg1: i32) -> (i32, i32) {
    %c1_i32 = arith.constant 1 : i32
    %0 = arith.muli %arg0, %c1_i32 : i32
    %1 = arith.addi %0, %arg1 : i32
    %c0_i32 = arith.constant 0 : i32
    %c0_i32_0 = arith.constant 0 : i32
    return %1, %c0_i32 : i32, i32
  }
  func.func @transform_1(%arg0: i32, %arg1: i32) -> (i32, i32) {
    %c1_i32 = arith.constant 1 : i32
    %0 = arith.muli %arg0, %c1_i32 : i32
    %1 = arith.addi %0, %arg1 : i32
    %c0_i32 = arith.constant 0 : i32
    %c0_i32_0 = arith.constant 0 : i32
    return %1, %c0_i32 : i32, i32
  }
  func.func @transform_2(%arg0: i32, %arg1: i32) -> (i32, i32, i32) {
    %c0_i32 = arith.constant 0 : i32
    %c0_i32_0 = arith.constant 0 : i32
    %c0_i32_1 = arith.constant 0 : i32
    return %arg0, %c0_i32, %c0_i32_0 : i32, i32, i32
  }
}

</mosaic_0001>

<bundles_post_ra>
// kernel: graph_readout_pallas.1
= control target key start
LH: loop header
LB: loop body
LE: loop exit
PB: predicated region body
PF: predicated region fallthrough
CT: control target
= control target key end

     0   :  { %v347_v2 = vmov 0   ;;  %s427_s0 = inlined_call_operand.vmem [shape: f32[64,128], index: 0, kind: input, shape index: {}]   ;;  %s428_s1 = inlined_call_operand.vmem [shape: s32[64,1], index: 1, kind: input, shape index: {}]   ;;  %s429_s2 = inlined_call_operand.hbm [shape: f32[1,8,128], index: 2, kind: output, shape index: {}]  }
   0x1   :  { %v71_v0 = vld [vmem:[%s428_s1 + $0x10] sm:$0xff]  ;;  %v69_v1 = vld [vmem:[%s428_s1] sm:$0xff]  ;;  %322 = vset.pattern.permute.xlu1 %v347_v2  ;;  %321 = vset.pattern.permute.xlu0 %v347_v2 }
   0x2   :  { %86 = vperm.xlu1 %322, %v71_v0   ;;  %80 = vperm.xlu0 %321, %v69_v1  }
   0x3   :  { %7 = vsyncpa [#allocation4], 0  ;;  %v72_v3 = vld [vmem:[%s428_s1 + $0x18] sm:$0xff]  ;;  %v70_v4 = vld [vmem:[%s428_s1 + $0x8] sm:$0xff]  ;;  %v348_v12 = vmov 0.0|0.0   ;;  %vm349_vm0 = vmmov 0   ;;  %v77_v23 = vlaneseq }
   0x4   :  { %v74_v5 = vld [vmem:[%s428_s1 + $0x28] sm:$0xff]  ;;  %v73_v6 = vld [vmem:[%s428_s1 + $0x20] sm:$0xff]  ;;  %v76_v7 = vld [vmem:[%s428_s1 + $0x38] sm:$0xff]  ;;  %304 = vmatprep.subr.bf16.mxu0 %v348_v12  ;;  %v350_v15 = vmov 0.0   ;;  %vm160_vm9 = vcmask 523264  }
   0x5   :  { %v75_v8 = vld [vmem:[%s428_s1 + $0x30] sm:$0xff]  ;;  %v61_v9 = vld [vmem:[%s427_s0] sm:$0xff]  ;;  %v62_v10 = vld [vmem:[%s427_s0 + $0x8] sm:$0xff]  ;;  %301 = vmatprep.mubr.msk.f32.mxu0 %vm349_vm0, %v350_v15  ;;  %v78_v24 = vand.u32 127, %v77_v23 }
   0x6   :  { %89 = vperm.xlu1 %322, %v72_v3   ;;  %83 = vperm.xlu0 %321, %v70_v4   ;;  %v63_v11 = vld [vmem:[%s427_s0 + $0x10] sm:$0xff]  ;;  %v305_v13 = vpack.c.bf16 %v62_v10, %v61_v9  ;;  %v64_v14 = vld [vmem:[%s427_s0 + $0x18] sm:$0xff]  ;;  %v65_v17 = vld [vmem:[%s427_s0 + $0x20] sm:$0xff] }
   0x7   :  { %v308_v16 = vpack.c.bf16 %v64_v14, %v63_v11  ;;  %v66_v18 = vld [vmem:[%s427_s0 + $0x28] sm:$0xff]  ;;  %v67_v20 = vld [vmem:[%s427_s0 + $0x30] sm:$0xff]  ;;  %v68_v21 = vld [vmem:[%s427_s0 + $0x38] sm:$0xff]  ;;  %s351_s0 = smov [#allocation3]  }
   0x8   :  { %306 = vmatpush3.bf16.msra.mxu0 %v305_v13  ;;  %v311_v19 = vpack.c.bf16 %v66_v18, %v65_v17  ;;  %v314_v22 = vpack.c.bf16 %v68_v21, %v67_v20  ;;  %s247_s12 = sshll.u32 %s351_s0, 4  ;;  %s248_s12 = int_to_ptr.vmem [resolvable:$true] %s247_s12 }
   0x9   :  { %307 = vmatprep.subr.bf16.mxu0 %v348_v12  ;;  %s323_s13 = scalar_lea.vmem %s248_s12, 128  ;;  %p328_p1 = scmp.lt.s32.totalorder %s248_s12, %s248_s12 }
   0xa   :  { %95 = vperm.xlu1 %322, %v74_v5   ;;  %92 = vperm.xlu0 %321, %v73_v6   ;;  %p324_p0 = scmp.ne.s32.totalorder %s248_s12, %s323_s13  ;;  %p329_p2 = scmp.lt.s32.totalorder %s323_s13, %s323_s13 }
   0xc   :  { %309 = vmatpush3.bf16.msra.mxu0 %v308_v16  ;;  %p330_p3 = por %p329_p2, %p328_p1 }
   0xd   :  { %310 = vmatprep.subr.bf16.mxu0 %v348_v12 }
   0xe   :  { %101 = vperm.xlu1 %322, %v76_v7   ;;  %98 = vperm.xlu0 %321, %v75_v8   ;;  %p331_p4 = pnand %p330_p3, %p324_p0 }
  0x10   :  { %312 = vmatpush3.bf16.msra.mxu0 %v311_v19 }
  0x11   :  { %313 = vmatprep.subr.bf16.mxu0 %v348_v12 }
  0x14   :  { %315 = vmatpush3.bf16.msra.mxu0 %v314_v22 }
  0x81   :  { %v81_v25 = vpop.permute.xlu0 %80  ;;  %v87_v27 = vpop.permute.xlu1 %86 }
  0x82   :  { %vm103_vm1 = vcmp.eq.s32.totalorder %v81_v25, %v78_v24  ;;  %vm105_vm2 = vcmp.eq.s32.totalorder %v87_v27, %v78_v24 }
  0x83   :  { %v267_v26 = vsel %vm103_vm1, 1.0, %v350_v15  ;;  %v269_v30 = vsel %vm105_vm2, 1.0, %v350_v15 }
  0x84   :  { %128 = vxpose.xlu0.b32.start [1/8] (short) (narrow) %v267_v26, 8 }
  0x85   :  { %v84_v28 = vpop.permute.xlu0 %83  ;;  %v90_v31 = vpop.permute.xlu1 %89 }
  0x86   :  { %vm104_vm3 = vcmp.eq.s32.totalorder %v84_v28, %v78_v24  ;;  %vm106_vm4 = vcmp.eq.s32.totalorder %v90_v31, %v78_v24 }
  0x87   :  { %v268_v29 = vsel %vm104_vm3, 1.0, %v350_v15  ;;  %v270_v33 = vsel %vm106_vm4, 1.0, %v350_v15 }
  0x88   :  { %129 = vxpose.xlu0.b32.cont [2/8] (short) (narrow) %v268_v29, 8 }
  0x89   :  { %v93_v32 = vpop.permute.xlu0 %92  ;;  %v96_v34 = vpop.permute.xlu1 %95 }
  0x8a   :  { %vm107_vm5 = vcmp.eq.s32.totalorder %v93_v32, %v78_v24  ;;  %vm108_vm6 = vcmp.eq.s32.totalorder %v96_v34, %v78_v24 }
  0x8b   :  { %v271_v35 = vsel %vm107_vm5, 1.0, %v350_v15  ;;  %v272_v37 = vsel %vm108_vm6, 1.0, %v350_v15 }
  0x8c   :  { %130 = vxpose.xlu0.b32.cont [3/8] (short) (narrow) %v269_v30, 8 }
  0x8d   :  { %v99_v36 = vpop.permute.xlu0 %98  ;;  %v102_v38 = vpop.permute.xlu1 %101 }
  0x8e   :  { %vm109_vm7 = vcmp.eq.s32.totalorder %v99_v36, %v78_v24  ;;  %vm110_vm8 = vcmp.eq.s32.totalorder %v102_v38, %v78_v24 }
  0x8f   :  { %v273_v39 = vsel %vm109_vm7, 1.0, %v350_v15  ;;  %v274_v40 = vsel %vm110_vm8, 1.0, %v350_v15 }
  0x90   :  { %131 = vxpose.xlu0.b32.cont [4/8] (short) (narrow) %v270_v33, 8 }
  0x94   :  { %132 = vxpose.xlu0.b32.cont [5/8] (short) (narrow) %v271_v35, 8 }
  0x98   :  { %133 = vxpose.xlu0.b32.cont [6/8] (short) (narrow) %v272_v37, 8 }
  0x9c   :  { %134 = vxpose.xlu0.b32.cont [7/8] (short) (narrow) %v273_v39, 8 }
  0xa0   :  { %135 = vxpose.xlu0.b32.end [8/8] (short) (narrow) %v274_v40, 8 }
 0x104   :  { %v144_v41 = vpop.trf.xlu0 }
 0x105   :  { %302 = vmatmul.mubr.msk.f32.vlgmr.msra.gmra.mrb[0].mxu0 %vm160_vm9, %v144_v41 }
 0x1d8   :  { %v230_v42 = vpop.f32.mrb[0].mxu0 }
 0x1d9   :  { %240 = vst [vmem:[#allocation3] sm:$0xff] %v230_v42  ;;  %v303_v43 = vpop.f32.mrb[1].mxu0 }
 0x1da   :  { %334 = shalt.err (!%p331_p4)
}
 0x1db   :  { %s335_s16 = scalar_lea.hbm %s429_s2, 128 }
 0x1dc   :  { %p336_p5 = scmp.ne.s32.totalorder %s429_s2, %s335_s16  ;;  %p339_p6 = scmp.lt.u32.totalorder %s335_s16, %s429_s2 }
 0x1de   :  { %p341_p7 = pnand %p339_p6, %p336_p5 }
 0x1e0   :  { %344 = shalt.err (!%p341_p7)
}
 0x1e1   :  { %250 = dma.vmem_to_hbm [thread:$0]  %s248_s12, 128, %s429_s2, [#allocation4]  }
 0x1e2   :  { %345 = dma.done.wait [#allocation4], 128  }
 0x1e3   :  { %346 = vsyncadd [#allocation4], 4294967168 }
 0x1e4   :  { %254 = vsyncpa [#allocation4], 1 }

</bundles_post_ra>
